<compile_context>
chip_gen: v7x
topology: tpu7x:2x2x1
jax: 0.10.0
libtpu: 0.0.40
codegen_flags: <defaults>
</compile_context>

<pallas_src>
import jax
import jax.numpy as jnp
from jax.experimental import pallas as pl
from jax.experimental.pallas import tpu as pltpu

LANE = 128
SUBLANE = 8


def _round_up(x, m):
    return (x + m - 1) // m * m


def make_conv2d(H, W, kh, kw, tm=8):
    """Build a pallas_call implementing corr2d(x, w) + b for fixed shapes."""
    Ho, Wo = H - kh + 1, W - kw + 1
    assert Ho > 0 and Wo > 0
    assert kh - 1 <= SUBLANE, "halo of one sublane tile assumed (kh <= 9)"

    W_pad = _round_up(max(W, LANE), LANE)        # lane-dense columns
    num_tiles = pl.cdiv(Ho, tm)                  # grid over output row tiles
    halo = SUBLANE                               # kh-1 rounded up to sublanes
    H_pad = max(num_tiles * tm + halo, _round_up(H, SUBLANE))
    Ho_pad = num_tiles * tm

    def kernel(x_ref, w_ref, b_ref, o_ref):
        # x_ref: (H_pad, W_pad) padded image, resident across grid steps (VMEM)
        # w_ref: (kh*kw,) f32 in SMEM; b_ref: (1,) f32 in SMEM
        # o_ref: (tm, W_pad) lane-dense output row tile
        off = pl.multiple_of(pl.program_id(0) * tm, tm)
        xw = x_ref[pl.ds(off, tm + halo), :]          # one aligned window load

        # Hoist the kh*kw scalar weight reads out of the MAC sequence.
        w = [w_ref[t] for t in range(kh * kw)]

        # Bias folded into the accumulator init (no epilogue add).
        acc = jnp.full((tm, W_pad), b_ref[0], dtype=jnp.float32)

        for i in range(kh):                           # static small loops
            xi = xw[i:i + tm, :]                      # sublane (row) shift
            for j in range(kw):
                # lane (col) shift on the XLU; roll by W_pad - j == roll by -j
                xij = xi if j == 0 else pltpu.roll(xi, W_pad - j, axis=1)
                acc = acc + xij * w[i * kw + j]       # VPU MAC

        o_ref[...] = acc                              # full unmasked vst

    call = pl.pallas_call(
        kernel,
        out_shape=jax.ShapeDtypeStruct((Ho_pad, W_pad), jnp.float32),
        grid=(num_tiles,),
        in_specs=[
            pl.BlockSpec((H_pad, W_pad), lambda i: (0, 0)),       # x (VMEM)
            pl.BlockSpec(memory_space=pltpu.MemorySpace.SMEM),    # w flat
            pl.BlockSpec(memory_space=pltpu.MemorySpace.SMEM),    # bias
        ],
        out_specs=pl.BlockSpec((tm, W_pad), lambda i: (i, 0)),
        compiler_params=pltpu.CompilerParams(
            dimension_semantics=("parallel",)),
    )

    def run(x, weight, bias):
        x_p = jnp.zeros((H_pad, W_pad), jnp.float32).at[:H, :W].set(
            x.astype(jnp.float32))
        y_pad = call(
            x_p,
            weight.astype(jnp.float32).reshape(-1),
            bias.astype(jnp.float32),
        )
        return y_pad[:Ho, :Wo]

    return run


def conv2d_forward(x, weight, bias):
    H, W = x.shape
    kh, kw = weight.shape
    return make_conv2d(H, W, kh, kw)(x, weight, bias)


def conv2d_reference(x, weight, bias):
    """Pure-JAX reference of corr2d(x, w) + b."""
    kh, kw = weight.shape
    Ho, Wo = x.shape[0] - kh + 1, x.shape[1] - kw + 1
    acc = jnp.zeros((Ho, Wo), jnp.float32)
    for i in range(kh):
        for j in range(kw):
            acc = acc + x[i:i + Ho, j:j + Wo] * weight[i, j]
    return acc + bias[0]


if __name__ == "__main__":
    key = jax.random.PRNGKey(0)
    k_x, k_w = jax.random.split(key)

    H, W = 16, 16
    kernel_size = (3, 3)

    # Module parameters (deterministic): weight ~ U[0,1) like torch.rand, bias zeros.
    weight = jax.random.uniform(k_w, kernel_size, dtype=jnp.float32)
    bias = jnp.zeros((1,), dtype=jnp.float32)

    # Example input (the 2D image the module's forward expects).
    x = jax.random.uniform(k_x, (H, W), dtype=jnp.float32)

    y = conv2d_forward(x, weight, bias)
    y = jax.block_until_ready(y)

    y_ref = conv2d_reference(x, weight, bias)
    assert y.shape == (H - kernel_size[0] + 1, W - kernel_size[1] + 1)
    assert jnp.allclose(y, y_ref, atol=1e-5, rtol=1e-5)

    print("KERNEL_OK")
</pallas_src>

<mosaic_0001>
module attributes {stable_mosaic.version = 11 : i64} {
  func.func @kernel(%arg0: i32, %arg1: memref<24x128xf32, #tpu.memory_space<vmem>>, %arg2: memref<9xf32, #tpu.memory_space<smem>>, %arg3: memref<1xf32, #tpu.memory_space<smem>>, %arg4: memref<8x128xf32, #tpu.memory_space<vmem>>) attributes {dimension_semantics = [#tpu.dimension_semantics<parallel>], iteration_bounds = array<i64: 2>, scalar_prefetch = 0 : i64, scratch_operands = 0 : i64, tpu.core_type = #tpu.core_type<tc>, window_params = [{pipeline_mode = #tpu.pipeline_mode<synchronous>, transform_indices = @transform_0, window_bounds = array<i64: 24, 128>}, {transform_indices = @transform_1, window_bounds = array<i64: 9>}, {transform_indices = @transform_2, window_bounds = array<i64: 1>}, {transform_indices = @transform_3, window_bounds = array<i64: 8, 128>}]} {
    %c8_i32 = arith.constant 8 : i32
    %0 = arith.muli %arg0, %c8_i32 : i32
    %1 = tpu.assume_multiple %0, 8 : i32
    %2 = arith.index_cast %1 : i32 to index
    %c0 = arith.constant 0 : index
    %3 = vector.load %arg1[%2, %c0] : memref<24x128xf32, #tpu.memory_space<vmem>>, vector<16x128xf32>
    %c0_0 = arith.constant 0 : index
    %4 = memref.load %arg2[%c0_0] : memref<9xf32, #tpu.memory_space<smem>>
    %c1 = arith.constant 1 : index
    %5 = memref.load %arg2[%c1] : memref<9xf32, #tpu.memory_space<smem>>
    %c2 = arith.constant 2 : index
    %6 = memref.load %arg2[%c2] : memref<9xf32, #tpu.memory_space<smem>>
    %c3 = arith.constant 3 : index
    %7 = memref.load %arg2[%c3] : memref<9xf32, #tpu.memory_space<smem>>
    %c4 = arith.constant 4 : index
    %8 = memref.load %arg2[%c4] : memref<9xf32, #tpu.memory_space<smem>>
    %c5 = arith.constant 5 : index
    %9 = memref.load %arg2[%c5] : memref<9xf32, #tpu.memory_space<smem>>
    %c6 = arith.constant 6 : index
    %10 = memref.load %arg2[%c6] : memref<9xf32, #tpu.memory_space<smem>>
    %c7 = arith.constant 7 : index
    %11 = memref.load %arg2[%c7] : memref<9xf32, #tpu.memory_space<smem>>
    %c8 = arith.constant 8 : index
    %12 = memref.load %arg2[%c8] : memref<9xf32, #tpu.memory_space<smem>>
    %c0_1 = arith.constant 0 : index
    %13 = memref.load %arg3[%c0_1] : memref<1xf32, #tpu.memory_space<smem>>
    %14 = vector.broadcast %13 : f32 to vector<8x128xf32>
    %15 = vector.extract_strided_slice %3 {offsets = [0, 0], sizes = [8, 128], strides = [1, 1]} : vector<16x128xf32> to vector<8x128xf32>
    %16 = vector.broadcast %4 : f32 to vector<8x128xf32>
    %17 = arith.mulf %15, %16 : vector<8x128xf32>
    %18 = arith.addf %14, %17 : vector<8x128xf32>
    %c127_i32 = arith.constant 127 : i32
    %19 = tpu.dynamic_rotate %15 by %c127_i32 dim 1 : vector<8x128xf32>, i32 -> vector<8x128xf32>
    %20 = vector.broadcast %5 : f32 to vector<8x128xf32>
    %21 = arith.mulf %19, %20 : vector<8x128xf32>
    %22 = arith.addf %18, %21 : vector<8x128xf32>
    %c126_i32 = arith.constant 126 : i32
    %23 = tpu.dynamic_rotate %15 by %c126_i32 dim 1 : vector<8x128xf32>, i32 -> vector<8x128xf32>
    %24 = vector.broadcast %6 : f32 to vector<8x128xf32>
    %25 = arith.mulf %23, %24 : vector<8x128xf32>
    %26 = arith.addf %22, %25 : vector<8x128xf32>
    %27 = vector.extract_strided_slice %3 {offsets = [1, 0], sizes = [8, 128], strides = [1, 1]} : vector<16x128xf32> to vector<8x128xf32>
    %28 = vector.broadcast %7 : f32 to vector<8x128xf32>
    %29 = arith.mulf %27, %28 : vector<8x128xf32>
    %30 = arith.addf %26, %29 : vector<8x128xf32>
    %c127_i32_2 = arith.constant 127 : i32
    %31 = tpu.dynamic_rotate %27 by %c127_i32_2 dim 1 : vector<8x128xf32>, i32 -> vector<8x128xf32>
    %32 = vector.broadcast %8 : f32 to vector<8x128xf32>
    %33 = arith.mulf %31, %32 : vector<8x128xf32>
    %34 = arith.addf %30, %33 : vector<8x128xf32>
    %c126_i32_3 = arith.constant 126 : i32
    %35 = tpu.dynamic_rotate %27 by %c126_i32_3 dim 1 : vector<8x128xf32>, i32 -> vector<8x128xf32>
    %36 = vector.broadcast %9 : f32 to vector<8x128xf32>
    %37 = arith.mulf %35, %36 : vector<8x128xf32>
    %38 = arith.addf %34, %37 : vector<8x128xf32>
    %39 = vector.extract_strided_slice %3 {offsets = [2, 0], sizes = [8, 128], strides = [1, 1]} : vector<16x128xf32> to vector<8x128xf32>
    %40 = vector.broadcast %10 : f32 to vector<8x128xf32>
    %41 = arith.mulf %39, %40 : vector<8x128xf32>
    %42 = arith.addf %38, %41 : vector<8x128xf32>
    %c127_i32_4 = arith.constant 127 : i32
    %43 = tpu.dynamic_rotate %39 by %c127_i32_4 dim 1 : vector<8x128xf32>, i32 -> vector<8x128xf32>
    %44 = vector.broadcast %11 : f32 to vector<8x128xf32>
    %45 = arith.mulf %43, %44 : vector<8x128xf32>
    %46 = arith.addf %42, %45 : vector<8x128xf32>
    %c126_i32_5 = arith.constant 126 : i32
    %47 = tpu.dynamic_rotate %39 by %c126_i32_5 dim 1 : vector<8x128xf32>, i32 -> vector<8x128xf32>
    %48 = vector.broadcast %12 : f32 to vector<8x128xf32>
    %49 = arith.mulf %47, %48 : vector<8x128xf32>
    %50 = arith.addf %46, %49 : vector<8x128xf32>
    %c0_6 = arith.constant 0 : index
    %c0_7 = arith.constant 0 : index
    %51 = vector.load %arg4[%c0_6, %c0_7] : memref<8x128xf32, #tpu.memory_space<vmem>>, vector<8x128xf32>
    tpu.vector_store %arg4[%c0_6, %c0_7], %50 {strides = array<i32>} : memref<8x128xf32, #tpu.memory_space<vmem>>, vector<8x128xf32>,
    return
  }
  func.func @transform_0(%arg0: i32) -> (i32, i32) {
    %c0_i32 = arith.constant 0 : i32
    %c0_i32_0 = arith.constant 0 : i32
    %c0_i32_1 = arith.constant 0 : i32
    return %c0_i32, %c0_i32_0 : i32, i32
  }
  func.func @transform_1(%arg0: i32) -> i32 {
    %c0_i32 = arith.constant 0 : i32
    %c0_i32_0 = arith.constant 0 : i32
    return %c0_i32 : i32
  }
  func.func @transform_2(%arg0: i32) -> i32 {
    %c0_i32 = arith.constant 0 : i32
    %c0_i32_0 = arith.constant 0 : i32
    return %c0_i32 : i32
  }
  func.func @transform_3(%arg0: i32) -> (i32, i32) {
    %c0_i32 = arith.constant 0 : i32
    %c0_i32_0 = arith.constant 0 : i32
    return %arg0, %c0_i32 : i32, i32
  }
}

</mosaic_0001>

<bundles_post_ra>
// kernel: tpu_custom_call.1
= control target key start
LH: loop header
LB: loop body
LE: loop exit
PB: predicated region body
PF: predicated region fallthrough
CT: control target
= control target key end

     0   :  { %s737_s0 = inlined_call_operand.hbm [shape: f32[24,128], index: 0, kind: input, shape index: {}]   ;;  %s738_s1 = inlined_call_operand.vmem [shape: f32[9], index: 1, kind: input, shape index: {}]   ;;  %s739_s2 = inlined_call_operand.<no memory space> [shape: f32[1], index: 2, kind: input, shape index: {}]   ;;  %s740_s3 = inlined_call_operand.hbm [shape: f32[16,128], index: 3, kind: output, shape index: {}]  }
   0x1   :  { %8 = sst [smem:[#allocation2]] %s739_s2 }
   0x2   :  { %9 = vsyncpa [#allocation4], 0 }
   0x3   :  { %10 = vsyncpa [#allocation6], 0 }
   0x4   :  { %11 = vsyncpa [#allocation5], 0 }
   0x5   :  { %13 = vsyncpa [#allocation5 + $0x1], 0  ;;  %s577_s14 = smov 0   ;;  %s579_s15 = smov 0  }
   0x6   :  { %s581_s16 = smov 0   ;;  %s583_s17 = smov 0  }
   0x7 LB: > { %s598_s2 = sadd.s32 4294967295, %s545_s17   ;;  %s347_s18 = sadd.s32 4294967294, %s545_s17   ;;  %s545_s17 = sphi %s583_s17, %s758_s17   ;;  %s541_s16 = sphi %s581_s16, %s757_s16   ;;  %s537_s15 = sphi %s579_s15, %s756_s15   ;;  %s533_s14 = sphi %s577_s14, %s755_s14  }
   0x8   : > { %s602_s19 = sadd.s32 1, %s545_s17   ;;  %s89_s20 = sadd.s32 1, %s541_s16 }
   0x9   : > { %s86_s21 = ssub.s32 %s545_s17, %s602_s19  ;;  %p99_p0 = scmp.ne.s32.totalorder %s541_s16, %s537_s15 }
   0xa   : > { %p87_p1 = scmp.eq.s32.totalorder %s86_s21, 0  ;;  %p100_p2 = scmp.eq.s32.totalorder %s598_s2, 1 }
   0xb   : > { %p105_p3 = scmp.ne.s32.totalorder %s537_s15, %s533_s14  ;;  %p106_p4 = scmp.eq.s32.totalorder %s347_s18, 1 }
   0xc   : > { %s613_s22 = scalar_select %p87_p1, %s541_s16, %s89_s20  }
   0xd   : > { %p615_p5 = por %p100_p2, %p99_p0  ;;  %p619_p6 = por %p106_p4, %p105_p3 }
   0xe   : > { %p348_p7 = scmp.ge.s32.totalorder %s545_s17, 1  ;;  %p113_p8 = scmp.lt.s32.totalorder %s545_s17, 3 }
   0xf   : > { %s744_s23 = scalar_select %p615_p5, 1, 0 }
  0x10   : > { %s745_s24 = scalar_select %p619_p6, 1, 0 }
  0x11   : > { %p741_p9 = scmp.eq.s32.totalorder %s598_s2, 0  ;;  %p626_p10 = pnand %p348_p7, %p113_p8 }
  0x12   : > { %s547_s26 = smov [#allocation3]   ;;  %s139_s30 = sshll.u32 %s738_s1, 4  ;;  %s641_s30 = int_to_ptr.vmem [resolvable:$true] %s139_s30 }
  0x13   : > { %s746_s25 = scalar_select %p626_p10, 1, 0 }
  0x14   : > { %s125_s27 = sshll.u32 %s547_s26, 4  ;;  %p378_p11 = pneg %p626_p10  ;;  %s126_s27 = int_to_ptr.vmem [resolvable:$true] %s125_s27 }
  0x15   : > { %s432_s7 = scalar_lea.hbm %s737_s0, 384 }
  0x16   : > { %p637_p12 = pnand %p741_p9, %p378_p11  ;;  %p433_p13 = scmp.ne.s32.totalorder %s737_s0, %s432_s7 }
  0x17   : > { %p439_p3 = scmp.lt.u32.totalorder %s432_s7, %s737_s0 }
  0x18   : > { %p434_p0 = pneg %p637_p12 }
  0x1a   : > { %p435_p1 = pnand %p434_p0, %p433_p13 }
  0x1c   : > { %p436_p2 = pneg %p435_p1 }
  0x1e   : > { %p441_p4 = pnand %p439_p3, %p436_p2 }
  0x20   : > { %444 = shalt.err (!%p441_p4)
}
  0x21   : > { %s445_s12 = scalar_lea.vmem %s126_s27, 384  ;;  %p453_p9 = scmp.lt.s32.totalorder %s126_s27, %s126_s27 }
  0x22   : > { %p446_p7 = scmp.ne.s32.totalorder %s126_s27, %s445_s12  ;;  %p454_p6 = scmp.lt.s32.totalorder %s445_s12, %s445_s12 }
  0x24   : > { %p448_p8 = pnand %p446_p7, %p434_p0  ;;  %p455_p5 = por %p454_p6, %p453_p9 }
  0x26   : > { %p449_p11 = pneg %p448_p8 }
  0x28   : > { %p456_p10 = pnand %p455_p5, %p449_p11 }
  0x2a   : > { %459 = shalt.err (!%p456_p10)
}
  0x2b   : > { %s548_s13 = smov 128   ;;  %s549_s18 = smov 8  }
  0x2c   : > { %381 = dma.hbm_to_vmem [thread:$0]  (!%p637_p12), %s737_s0, 384, %s126_s27, [#allocation4], %s548_s13, %s548_s13, %s549_s18  }
  0x2d   : > { %s460_s26 = scalar_lea.vmem %s641_s30, 16  ;;  %p468_p5 = scmp.lt.s32.totalorder %s641_s30, %s641_s30 }
  0x2e   : > { %p461_p13 = scmp.ne.s32.totalorder %s641_s30, %s460_s26  ;;  %p469_p9 = scmp.lt.s32.totalorder %s460_s26, %s460_s26 }
  0x30   : > { %p463_p1 = pnand %p461_p13, %p434_p0  ;;  %p470_p10 = por %p469_p9, %p468_p5 }
  0x32   : > { %p464_p6 = pneg %p463_p1 }
  0x34   : > { %p471_p2 = pnand %p470_p10, %p464_p6 }
  0x36   : > { %474 = shalt.err (!%p471_p2)
}
  0x37   : > { %s550_s28 = smov [#allocation7]   ;;  %p748_p3 = scmp.ne.s32.totalorder %s746_s25, 0 }
  0x38   : > { %384 = dma.vmem_to_smem (!%p637_p12), %s641_s30, 16, %s550_s28, [#allocation6]  }
  0x39   : > { %155 = sbr.rel (%p748_p3) target bundleno = 223 (0xdf), region = 32  ;;  %p749_p4 = scmp.eq.s32.totalorder (!%p748_p3), %s598_s2, 0 }
  0x40   : > { %520 = dma.done.wait (%p749_p4), [#allocation4], 384   ;;  %p750_p0 = pmov %p749_p4 }
  0x42   : > { %522 = vsyncadd (%p750_p0), [#allocation4], 4294966912  ;;  %p751_p7 = pmov %p750_p0 }
  0x43   : > { %p752_p8 = pmov %p750_p0 }
  0x44   : > { %524 = dma.done.wait (%p751_p7), [#allocation6], 16  }
  0x45   : > { %526 = vsyncadd (%p752_p8), [#allocation6], 4294967280 }
  0x46   : > { %165 = sfence }
  0x47   : > { %s355_s27 = sshll.u32 %s598_s2, 3  ;;  %s358_s25 = sld [smem:[#allocation7 + $0x3]]  ;;  %vm212_vm0 = vcmask 1046528   ;;  %vm239_vm1 = vcmask 1045504  }
  0x48   : > { %s180_s29 = scalar_lea.vmem [#allocation3], %s355_s27  ;;  %s551_s30 = smov 127  }
  0x49   : > { %v181_v0 = vld [vmem:[%s180_s29] sm:$0xff]  ;;  %v182_v1 = vld [vmem:[%s180_s29 + $0x8] sm:$0xff]  ;;  %s361_s4 = sld [smem:[#allocation7 + $0x6]]  ;;  %s552_s5 = smov 126  }
  0x4a   : > { %197 = vrot.lane.b32.xlu0 %v181_v0, %s551_s30  ;;  %v220_v2 = vrot.slane %v181_v0, 1  ;;  %v221_v3 = vrot.slane %v182_v1, 1  ;;  %v245_v4 = vrot.slane %v181_v0, 2  ;;  %v246_v5 = vrot.slane %v182_v1, 2  ;;  %s183_s6 = sld [smem:[#allocation7]]  ;;  %s356_s7 = sld [smem:[#allocation7 + $0x1]] }
  0x4b   : > { %s192_s8 = sld [smem:[#allocation2]]  ;;  %s357_s9 = sld [smem:[#allocation7 + $0x2]] }
  0x4c   : > { %v222_v6 = vsel %vm212_vm0, %v220_v2, %v221_v3  ;;  %v247_v8 = vsel %vm239_vm1, %v245_v4, %v246_v5  ;;  %s359_s10 = sld [smem:[#allocation7 + $0x4]]  ;;  %s360_s11 = sld [smem:[#allocation7 + $0x5]] }
  0x4d   : > { %224 = vrot.lane.b32.xlu1 %v222_v6, %s551_s30  ;;  %v207_v7 = vstv %s358_s25  ;;  %s362_s12 = sld [smem:[#allocation7 + $0x7]]  ;;  %s363_s13 = sld [smem:[#allocation7 + $0x8]] }
  0x4e   : > { %202 = vrot.lane.b32.xlu0 %v181_v0, %s552_s5  ;;  %v209_v9 = vmul.f32 %v207_v7, %v182_v1  ;;  %v208_v10 = vmul.f32 %v207_v7, %v181_v0  ;;  %s176_s18 = sand.u32 1, %s537_s15   ;;  %s365_s21 = sshll.u32 %s598_s2, 7 }
  0x4f   : > { %v234_v13 = vstv %s361_s4  ;;  %s354_s20 = sshll.u32 %s176_s18, 3  ;;  %s695_s25 = scalar_lea.hbm %s740_s3, %s365_s21 }
  0x50   : > { %v214_v11 = vrot.slane %v209_v9, 1  ;;  %v213_v12 = vrot.slane %v208_v10, 1  ;;  %v236_v15 = vmul.f32 %v234_v13, %v182_v1  ;;  %v235_v16 = vmul.f32 %v234_v13, %v181_v0  ;;  %s178_s26 = scalar_lea.vmem [#allocation8], %s354_s20  ;;  %p753_p11 = scmp.ne.s32.totalorder %s744_s23, 0 }
  0x51   : > { %229 = vrot.lane.b32.xlu1 %v222_v6, %s552_s5  ;;  %v194_v20 = vstv %s183_s6  ;;  %v193_v22 = vstv %s192_s8  ;;  %v199_v23 = vstv %s356_s7  ;;  %s274_s28 = sshll.u32 %s178_s26, 4  ;;  %s553_s2 = smov [#allocation8]   ;;  %s697_s28 = int_to_ptr.vmem [resolvable:$true] %s274_s28 }
  0x52   : > { %249 = vrot.lane.b32.xlu0 %v247_v8, %s551_s30  ;;  %v215_v14 = vsel %vm212_vm0, %v213_v12, %v214_v11  ;;  %v241_v17 = vrot.slane %v236_v15, 2  ;;  %v240_v18 = vrot.slane %v235_v16, 2  ;;  %v195_v21 = vmul.f32 %v194_v20, %v181_v0  ;;  %s261_s30 = scalar_lea.sflag [#allocation5], %s176_s18  ;;  %s475_s4 = scalar_lea.vmem %s697_s28, 128 }
  0x53   : > { %v204_v27 = vstv %s357_s9  ;;  %v226_v32 = vstv %s359_s10  ;;  %v231_v33 = vstv %s360_s11  ;;  %v251_v39 = vstv %s362_s12  ;;  %p476_p12 = scmp.ne.s32.totalorder %s697_s28, %s475_s4 }
  0x54   : > { %v242_v19 = vsel %vm239_vm1, %v240_v18, %v241_v17  ;;  %v196_v25 = vadd.f32 %v195_v21, %v193_v22  ;;  %v256_v42 = vstv %s363_s13 }
  0x55   : > { %254 = vrot.lane.b32.xlu1 %v247_v8, %s552_s5  ;;  %p477_p13 = pnand %p476_p12, %p753_p11  ;;  %s479_s5 = sshll.u32 %s553_s2, 4  ;;  %s480_s5 = int_to_ptr.vmem [resolvable:$false] %s479_s5 }
  0x56   : > { %s481_s6 = scalar_lea.vmem %s480_s5, 256  ;;  %p482_p6 = scmp.lt.s32.totalorder %s697_s28, %s480_s5 }
  0x57   : > { %p478_p1 = pneg %p477_p13  ;;  %p483_p5 = scmp.lt.s32.totalorder %s481_s6, %s475_s4 }
  0x59   : > { %p484_p9 = por %p483_p5, %p482_p6 }
  0x5b   : > { %p485_p10 = pnand %p484_p9, %p478_p1 }
  0xbc   : > { %v198_v24 = vpop.permute.xlu0 %197 }
  0xbd   : > { %v200_v26 = vmul.f32 %v199_v23, %v198_v24 }
  0xbf   : > { %v225_v28 = vpop.permute.xlu1 %224  ;;  %v201_v30 = vadd.f32 %v200_v26, %v196_v25 }
  0xc0   : > { %v203_v29 = vpop.permute.xlu0 %202  ;;  %v227_v37 = vmul.f32 %v226_v32, %v225_v28 }
  0xc1   : > { %v205_v31 = vmul.f32 %v204_v27, %v203_v29 }
  0xc3   : > { %v206_v34 = vadd.f32 %v205_v31, %v201_v30  ;;  %v230_v35 = vpop.permute.xlu1 %229 }
  0xc4   : > { %v232_v38 = vmul.f32 %v231_v33, %v230_v35  ;;  %v250_v40 = vpop.permute.xlu0 %249 }
  0xc5   : > { %v217_v36 = vadd.f32 %v215_v14, %v206_v34  ;;  %v252_v45 = vmul.f32 %v251_v39, %v250_v40 }
  0xc7   : > { %v228_v41 = vadd.f32 %v227_v37, %v217_v36  ;;  %v255_v43 = vpop.permute.xlu1 %254 }
  0xc8   : > { %v257_v47 = vmul.f32 %v256_v42, %v255_v43 }
  0xc9   : > { %v233_v44 = vadd.f32 %v232_v38, %v228_v41 }
  0xcb   : > { %v244_v46 = vadd.f32 %v242_v19, %v233_v44 }
  0xcd   : > { %v253_v48 = vadd.f32 %v252_v45, %v244_v46 }
  0xcf   : > { %v258_v49 = vadd.f32 %v257_v47, %v253_v48 }
  0xd1   : > { %259 = vst [vmem:[%s178_s26] sm:$0xff] %v258_v49 }
  0xd2   : > { %488 = shalt.err (!%p485_p10)
}
  0xd3   : > { %s489_s7 = scalar_lea.hbm %s695_s25, 128  ;;  %s493_s10 = scalar_lea.hbm %s740_s3, 256 }
  0xd4   : > { %p490_p2 = scmp.ne.s32.totalorder %s695_s25, %s489_s7  ;;  %p494_p0 = scmp.lt.u32.totalorder %s695_s25, %s740_s3 }
  0xd5   : > { %p495_p7 = scmp.lt.u32.totalorder %s493_s10, %s489_s7  ;;  %p497_p12 = scmp.lt.u32.totalorder %s489_s7, %s695_s25 }
  0xd6   : > { %p491_p3 = pnand %p490_p2, %p753_p11 }
  0xd7   : > { %p496_p8 = por %p495_p7, %p494_p0 }
  0xd8   : > { %p492_p4 = pneg %p491_p3 }
  0xd9   : > { %p498_p13 = por %p497_p12, %p496_p8 }
  0xdb   : > { %p499_p1 = pnand %p498_p13, %p492_p4 }
  0xdd   : > { %502 = shalt.err (!%p499_p1)
}
  0xde   : > { %376 = dma.vmem_to_hbm [thread:$0]  (%p753_p11), %s697_s28, 128, %s695_s25, %s261_s30  }
  0xdf PF: > { %p393_p6 = scmp.ge.s32.totalorder %s545_s17, 2  ;;  %s286_s13 = sand.u32 1, %s533_s14  }
  0xe0   : > { %p754_p5 = scmp.ne.s32.totalorder %s745_s24, 0  ;;  %s287_s18 = scalar_lea.sflag [#allocation5], %s286_s13 }
  0xe2   : > { %p386_p9 = pnand %p393_p6, %p754_p5 }
  0xe4   : > { %528 = dma.done.wait (!%p386_p9), %s287_s18, 128  }
  0xe5   : > { %530 = vsyncadd (!%p386_p9), %s287_s18, 4294967168  ;;  %p16_p10 = scmp.ge.s32.totalorder %s602_s19, 4   ;;  %s755_s14 = smov %s537_s15 }
  0xe6   : > { %s756_s15 = smov %s541_s16  ;;  %s757_s16 = smov %s613_s22 }
  0xe7   : > { %s758_s17 = smov %s602_s19  ;;  %18 = sbr.rel (!%p16_p10) target bundleno = 7 (0x7), region = 75 }
  0xee   :  { %292 = vsyncpa [#allocation4], 1 }
  0xef   :  { %294 = vsyncpa [#allocation4 + $0x1], 1 }
  0xf0   :  { %295 = vsyncpa [#allocation5], 1 }
  0xf1   :  { %297 = vsyncpa [#allocation5 + $0x1], 1 }
  0xf2   :  { %298 = vsyncpa [#allocation6], 1 }
  0xf3   :  { %300 = vsyncpa [#allocation6 + $0x1], 1 }

</bundles_post_ra>
